<compile_context>
chip_gen: v6e
topology: v6e:2x2x1
jax: 0.10.0
libtpu: 0.0.40
codegen_flags: <defaults>
</compile_context>

<pallas_src>
import functools

import jax
import jax.numpy as jnp
from jax.experimental import pallas as pl
from jax.experimental.pallas import tpu as pltpu


# ----------------------------- Pallas kernel --------------------------------
def _encoder_kernel(x_hbm, a_ref, w_ref, b_ref, o_hbm, h_scr, o_stage, sem):
    # Grid: (layer l, row-tile i) — both axes strictly sequential.
    #   x_hbm   : (Np, P)    bf16  padded input features, left in HBM (pl.ANY)
    #   a_ref   : (Np, Np)   bf16  padded A_hat, VMEM-resident (constant block)
    #   w_ref   : (1, P, P)  bf16  padded weight of layer l
    #   b_ref   : (1, 1, P)  f32   padded bias of layer l
    #   o_hbm   : (Np, P)    f32   output, left in HBM (pl.ANY), DMA'd at last l
    #   h_scr   : (2, Np, P) bf16  ping-pong activations (read l%2, write 1-l%2)
    #   o_stage : (TN, P)    f32   staging tile for the final-output DMA
    #   sem     : scalar DMA semaphore (shared by the blocking copies)
    l = pl.program_id(0)
    i = pl.program_id(1)
    num_layers = pl.num_programs(0)
    tile_n = o_stage.shape[0]
    row0 = pl.multiple_of(i * tile_n, tile_n)

    # One-time init: H^(0) = X (layer 0 reads slot 0).
    @pl.when(jnp.logical_and(l == 0, i == 0))
    def _init_h():
        cp = pltpu.make_async_copy(x_hbm, h_scr.at[0], sem)
        cp.start()
        cp.wait()

    read_slot = l % 2
    write_slot = 1 - read_slot

    # (A_tile @ H) @ W_l  — identical padded FLOPs to A_tile @ (H @ W_l) at
    # P = 128, but uniform per-step work (keeps DMA/MXU pipeline balanced).
    a_tile = a_ref[pl.ds(row0, tile_n), :]                        # (TN, Np) bf16
    ah = jnp.dot(a_tile, h_scr[read_slot],
                 preferred_element_type=jnp.float32)              # (TN, P) f32
    acc = jnp.dot(ah.astype(jnp.bfloat16), w_ref[0],
                  preferred_element_type=jnp.float32)             # (TN, P) f32
    acc = jnp.maximum(acc + b_ref[0], 0.0)                        # bias + ReLU

    # Stash this layer's activation rows for the next layer (other slot).
    @pl.when(l + 1 < num_layers)
    def _store_next_h():
        h_scr[write_slot, pl.ds(row0, tile_n), :] = acc.astype(jnp.bfloat16)

    # Only the final layer writes anything back to HBM.
    @pl.when(l + 1 == num_layers)
    def _writeback():
        o_stage[...] = acc
        cp = pltpu.make_async_copy(
            o_stage, o_hbm.at[pl.ds(row0, tile_n), :], sem)
        cp.start()
        cp.wait()


def _encoder_pallas(x_p, a_p, w_all, b_all, *, tile_n):
    k = w_all.shape[0]
    np_, p = x_p.shape
    r = np_ // tile_n

    # Explicit VMEM budget: resident A (x2 conservatively for pipeliner
    # buffers), ping-pong activations, per-layer W/b double buffers, staging.
    vmem_bytes = (2 * np_ * np_ * 2          # A_hat (bf16)
                  + 2 * np_ * p * 2          # ping-pong activations (bf16)
                  + 2 * (p * p * 2 + p * 4)  # W_l / b_l double buffers
                  + tile_n * p * 4           # f32 output staging tile
                  + (4 << 20))               # headroom
    vmem_limit = int(min(max(vmem_bytes, 16 << 20), 64 << 20))

    return pl.pallas_call(
        _encoder_kernel,
        out_shape=jax.ShapeDtypeStruct((np_, p), jnp.float32),
        grid_spec=pltpu.PrefetchScalarGridSpec(
            num_scalar_prefetch=0,
            grid=(k, r),
            in_specs=[
                pl.BlockSpec(memory_space=pl.ANY),                  # X (HBM)
                pl.BlockSpec((np_, np_), lambda l, i: (0, 0)),      # A resident
                pl.BlockSpec((1, p, p), lambda l, i: (l, 0, 0)),    # W_l
                pl.BlockSpec((1, 1, p), lambda l, i: (l, 0, 0)),    # b_l
            ],
            out_specs=pl.BlockSpec(memory_space=pl.ANY),            # out (HBM)
            scratch_shapes=[
                pltpu.VMEM((2, np_, p), jnp.bfloat16),  # ping-pong activations
                pltpu.VMEM((tile_n, p), jnp.float32),   # output staging tile
                pltpu.SemaphoreType.DMA(()),
            ],
        ),
        compiler_params=pltpu.CompilerParams(
            # Layer axis is a true dependence; row tiles of one layer share the
            # ping-pong scratch, so both axes must stay sequential.
            dimension_semantics=("arbitrary", "arbitrary"),
            vmem_limit_bytes=vmem_limit,
        ),
    )(x_p, a_p, w_all, b_all)


# ------------------------------ Encoder (glue) -------------------------------
def _round_up(x, m):
    return (x + m - 1) // m * m


def build_normalized_adjacency(edge_index, num_nodes):
    """A_hat = D^{-1/2} (A + I_remaining) D^{-1/2}, dense, from (2, E) edges.

    Scatter-ADD of unit edge weights (duplicates accumulate) and self loops
    added only where missing — matches torch_geometric's gcn_norm behaviour.
    """
    src, dst = edge_index[0], edge_index[1]
    a = jnp.zeros((num_nodes, num_nodes), jnp.float32)
    a = a.at[dst, src].add(1.0)
    has_self = jnp.diag(a) > 0
    a = a + jnp.diag(jnp.where(has_self, 0.0, 1.0))
    deg = jnp.sum(a, axis=1)
    dinv = jnp.where(deg > 0, 1.0 / jnp.sqrt(deg), 0.0)
    return dinv[:, None] * a * dinv[None, :]


@functools.partial(jax.jit, static_argnames=("tile_n", "feat_pad"))
def encoder_forward(x, a_hat, weights, biases, *, tile_n=128, feat_pad=128):
    """Full K-layer GCN encoder, fused into a single Pallas kernel."""
    n, f_in = x.shape
    p = feat_pad
    assert f_in <= p and all(
        w.shape[0] <= p and w.shape[1] <= p for w in weights
    ), "feature dims must fit the 128-lane padding"
    np_ = _round_up(n, tile_n)

    # bf16 inputs (f32 accumulation happens inside the kernel).
    x_p = jnp.zeros((np_, p), jnp.bfloat16).at[:n, :f_in].set(
        x.astype(jnp.bfloat16))
    a_p = jnp.zeros((np_, np_), jnp.bfloat16).at[:n, :n].set(
        a_hat.astype(jnp.bfloat16))
    w_all = jnp.stack([
        jnp.zeros((p, p), jnp.bfloat16)
        .at[: w.shape[0], : w.shape[1]].set(w.astype(jnp.bfloat16))
        for w in weights
    ])
    b_all = jnp.stack([
        jnp.zeros((1, p), jnp.float32)
        .at[:, : b.shape[-1]].set(b.astype(jnp.float32))
        for b in biases
    ])

    out_p = _encoder_pallas(x_p, a_p, w_all, b_all, tile_n=tile_n)
    f_out = weights[-1].shape[1]
    return out_p[:n, :f_out]


# -------------------------------- reference ----------------------------------
def encoder_reference(x, a_hat, weights, biases):
    h = x
    for w, b in zip(weights, biases):
        h = jnp.maximum(a_hat @ (h @ w) + b, 0.0)
    return h


if __name__ == "__main__":
    key = jax.random.PRNGKey(0)

    N = 200              # nodes (padded to 256 inside the wrapper)
    IN_CHANNELS = 16
    OUT_CHANNELS = 16
    HIDDEN = 2 * OUT_CHANNELS
    K = 2
    E = 800              # directed edges

    k_x, k_e, k_w, k_b = jax.random.split(key, 4)
    x = jax.random.normal(k_x, (N, IN_CHANNELS), jnp.float32)
    edge_index = jax.random.randint(k_e, (2, E), 0, N, dtype=jnp.int32)
    a_hat = build_normalized_adjacency(edge_index, N)

    # Glorot weights + small random biases per GCNConv layer.
    dims = [IN_CHANNELS] + [HIDDEN] * (K - 1) + [OUT_CHANNELS]
    wkeys = jax.random.split(k_w, K)
    bkeys = jax.random.split(k_b, K)
    weights, biases = [], []
    for i in range(K):
        fin, fo = dims[i], dims[i + 1]
        scale = jnp.sqrt(6.0 / (fin + fo))
        weights.append(
            jax.random.uniform(wkeys[i], (fin, fo), jnp.float32, -scale, scale))
        biases.append(0.1 * jax.random.normal(bkeys[i], (fo,), jnp.float32))
    weights, biases = tuple(weights), tuple(biases)

    out = encoder_forward(x, a_hat, weights, biases)
    out = jax.block_until_ready(out)

    ref = encoder_reference(x, a_hat, weights, biases)
    assert out.shape == (N, OUT_CHANNELS)
    max_err = float(jnp.max(jnp.abs(out - ref)))
    # bf16 inputs with f32 accumulation -> compare against the f32 reference
    # with a bf16-appropriate tolerance.
    assert jnp.allclose(out, ref, atol=1e-1, rtol=1e-1), max_err

    print("KERNEL_OK")
</pallas_src>

<mosaic_0001>
module attributes {stable_mosaic.version = 11 : i64} {
  func.func @_encoder_kernel(%arg0: i32, %arg1: i32, %arg2: memref<256x128xbf16, #tpu.memory_space<any>>, %arg3: memref<256x256xbf16, #tpu.memory_space<vmem>>, %arg4: memref<1x128x128xbf16, #tpu.memory_space<vmem>>, %arg5: memref<1x1x128xf32, #tpu.memory_space<vmem>>, %arg6: memref<256x128xf32, #tpu.memory_space<any>>, %arg7: memref<2x256x128xbf16, #tpu.memory_space<vmem>>, %arg8: memref<128x128xf32, #tpu.memory_space<vmem>>, %arg9: memref<!tpu.dma_semaphore, #tpu.memory_space<semaphore_mem>>) attributes {dimension_semantics = [#tpu.dimension_semantics<arbitrary>, #tpu.dimension_semantics<arbitrary>], iteration_bounds = array<i64: 2, 2>, scalar_prefetch = 0 : i64, scratch_operands = 3 : i64, tpu.core_type = #tpu.core_type<tc>, window_params = [{}, {pipeline_mode = #tpu.pipeline_mode<synchronous>, transform_indices = @transform_1, window_bounds = array<i64: 256, 256>}, {transform_indices = @transform_2, window_bounds = array<i64: 1, 128, 128>}, {transform_indices = @transform_3, window_bounds = array<i64: 1, 1, 128>}, {}]} {
    %c128_i32 = arith.constant 128 : i32
    %0 = arith.muli %arg1, %c128_i32 : i32
    %1 = tpu.assume_multiple %0, 128 : i32
    %c0_i32 = arith.constant 0 : i32
    %2 = arith.cmpi eq, %arg0, %c0_i32 : i32
    %c0_i32_0 = arith.constant 0 : i32
    %3 = arith.cmpi eq, %arg1, %c0_i32_0 : i32
    %4 = arith.andi %2, %3 : i1
    %5 = arith.extui %4 : i1 to i32
    %c0_i32_1 = arith.constant 0 : i32
    %6 = arith.cmpi ne, %5, %c0_i32_1 : i32
    scf.if %6 {
      %c0_i32_23 = arith.constant 0 : i32
      %c0_i32_24 = arith.constant 0 : i32
      %c0_i32_25 = arith.constant 0 : i32
      %42 = tpu.memref_slice %arg7[%c0_i32_23, %c0_i32_24, %c0_i32_25] : memref<2x256x128xbf16, #tpu.memory_space<vmem>> -> memref<1x256x128xbf16, #tpu.memory_space<vmem>>
      %43 = tpu.memref_squeeze %42 : memref<1x256x128xbf16, #tpu.memory_space<vmem>> -> memref<256x128xbf16, #tpu.memory_space<vmem>>
      tpu.enqueue_dma source(%arg2 : memref<256x128xbf16, #tpu.memory_space<any>>) target(%43 : memref<256x128xbf16, #tpu.memory_space<vmem>>) target_semaphore(%arg9 : memref<!tpu.dma_semaphore, #tpu.memory_space<semaphore_mem>>)
      %c0_i32_26 = arith.constant 0 : i32
      %c0_i32_27 = arith.constant 0 : i32
      %c0_i32_28 = arith.constant 0 : i32
      %44 = tpu.memref_slice %arg7[%c0_i32_26, %c0_i32_27, %c0_i32_28] : memref<2x256x128xbf16, #tpu.memory_space<vmem>> -> memref<1x256x128xbf16, #tpu.memory_space<vmem>>
      %45 = tpu.memref_squeeze %44 : memref<1x256x128xbf16, #tpu.memory_space<vmem>> -> memref<256x128xbf16, #tpu.memory_space<vmem>>
      tpu.wait_dma2 semaphore(%arg9 : memref<!tpu.dma_semaphore, #tpu.memory_space<semaphore_mem>>) src(%arg2 : memref<256x128xbf16, #tpu.memory_space<any>>) dst(%45 : memref<256x128xbf16, #tpu.memory_space<vmem>>)
    } else {
    }
    %c2_i32 = arith.constant 2 : i32
    %c0_i32_2 = arith.constant 0 : i32
    %7 = arith.cmpi eq, %c2_i32, %c0_i32_2 : i32
    %c1_i32 = arith.constant 1 : i32
    %8 = arith.select %7, %c1_i32, %c2_i32 : i32
    %9 = arith.remsi %arg0, %8 : i32
    %c0_i32_3 = arith.constant 0 : i32
    %10 = arith.cmpi ne, %9, %c0_i32_3 : i32
    %c0_i32_4 = arith.constant 0 : i32
    %11 = arith.cmpi slt, %9, %c0_i32_4 : i32
    %c0_i32_5 = arith.constant 0 : i32
    %12 = arith.cmpi slt, %8, %c0_i32_5 : i32
    %13 = arith.xori %11, %12 : i1
    %14 = arith.andi %13, %10 : i1
    %15 = arith.addi %9, %8 : i32
    %16 = arith.select %14, %15, %9 : i32
    %c1_i32_6 = arith.constant 1 : i32
    %17 = arith.subi %c1_i32_6, %16 : i32
    %18 = arith.index_cast %1 : i32 to index
    %c0 = arith.constant 0 : index
    %19 = vector.load %arg3[%18, %c0] : memref<256x256xbf16, #tpu.memory_space<vmem>>, vector<128x256xbf16>
    %20 = arith.index_cast %16 : i32 to index
    %c0_7 = arith.constant 0 : index
    %c0_8 = arith.constant 0 : index
    %21 = vector.load %arg7[%20, %c0_7, %c0_8] : memref<2x256x128xbf16, #tpu.memory_space<vmem>>, vector<1x256x128xbf16>
    %22 = vector.shape_cast %21 : vector<1x256x128xbf16> to vector<256x128xbf16>
    %cst = arith.constant dense<0.000000e+00> : vector<128x128xf32>
    %23 = tpu.matmul %19, %22, %cst {dimension_numbers = #tpu.dot_dimension_numbers<[1], [0], [0], [1], [0, 0, 1, 1], [], []>} : vector<128x256xbf16>, vector<256x128xbf16>, vector<128x128xf32> -> vector<128x128xf32>
    %24 = arith.truncf %23 : vector<128x128xf32> to vector<128x128xbf16>
    %c0_9 = arith.constant 0 : index
    %c0_10 = arith.constant 0 : index
    %c0_11 = arith.constant 0 : index
    %25 = vector.load %arg4[%c0_9, %c0_10, %c0_11] : memref<1x128x128xbf16, #tpu.memory_space<vmem>>, vector<1x128x128xbf16>
    %26 = vector.shape_cast %25 : vector<1x128x128xbf16> to vector<128x128xbf16>
    %cst_12 = arith.constant dense<0.000000e+00> : vector<128x128xf32>
    %27 = tpu.matmul %24, %26, %cst_12 {dimension_numbers = #tpu.dot_dimension_numbers<[1], [0], [0], [1], [0, 0, 1, 1], [], []>} : vector<128x128xbf16>, vector<128x128xbf16>, vector<128x128xf32> -> vector<128x128xf32>
    %c0_13 = arith.constant 0 : index
    %c0_14 = arith.constant 0 : index
    %c0_15 = arith.constant 0 : index
    %28 = vector.load %arg5[%c0_13, %c0_14, %c0_15] : memref<1x1x128xf32, #tpu.memory_space<vmem>>, vector<1x1x128xf32>
    %29 = vector.shape_cast %28 : vector<1x1x128xf32> to vector<1x128xf32>
    %30 = vector.broadcast %29 : vector<1x128xf32> to vector<128x128xf32>
    %31 = arith.addf %27, %30 : vector<128x128xf32>
    %cst_16 = arith.constant 0.000000e+00 : f32
    %32 = vector.broadcast %cst_16 : f32 to vector<128x128xf32>
    %33 = arith.maximumf %31, %32 : vector<128x128xf32>
    %c1_i32_17 = arith.constant 1 : i32
    %34 = arith.addi %arg0, %c1_i32_17 : i32
    %c2_i32_18 = arith.constant 2 : i32
    %35 = arith.cmpi slt, %34, %c2_i32_18 : i32
    %36 = arith.extui %35 : i1 to i32
    %c0_i32_19 = arith.constant 0 : i32
    %37 = arith.cmpi ne, %36, %c0_i32_19 : i32
    scf.if %37 {
      %42 = arith.truncf %33 : vector<128x128xf32> to vector<128x128xbf16>
      %43 = arith.index_cast %17 : i32 to index
      %44 = arith.index_cast %1 : i32 to index
      %c0_23 = arith.constant 0 : index
      %45 = vector.load %arg7[%43, %44, %c0_23] : memref<2x256x128xbf16, #tpu.memory_space<vmem>>, vector<1x128x128xbf16>
      %46 = vector.shape_cast %45 : vector<1x128x128xbf16> to vector<128x128xbf16>
      %47 = vector.shape_cast %42 : vector<128x128xbf16> to vector<1x128x128xbf16>
      tpu.vector_store %arg7[%43, %44, %c0_23], %47 {strides = array<i32>} : memref<2x256x128xbf16, #tpu.memory_space<vmem>>, vector<1x128x128xbf16>,
    } else {
    }
    %c1_i32_20 = arith.constant 1 : i32
    %38 = arith.addi %arg0, %c1_i32_20 : i32
    %c2_i32_21 = arith.constant 2 : i32
    %39 = arith.cmpi eq, %38, %c2_i32_21 : i32
    %40 = arith.extui %39 : i1 to i32
    %c0_i32_22 = arith.constant 0 : i32
    %41 = arith.cmpi ne, %40, %c0_i32_22 : i32
    scf.if %41 {
      %c0_23 = arith.constant 0 : index
      %c0_24 = arith.constant 0 : index
      %42 = vector.load %arg8[%c0_23, %c0_24] : memref<128x128xf32, #tpu.memory_space<vmem>>, vector<128x128xf32>
      tpu.vector_store %arg8[%c0_23, %c0_24], %33 {strides = array<i32>} : memref<128x128xf32, #tpu.memory_space<vmem>>, vector<128x128xf32>,
      %c0_i32_25 = arith.constant 0 : i32
      %43 = tpu.memref_slice %arg6[%1, %c0_i32_25] : memref<256x128xf32, #tpu.memory_space<any>> -> memref<128x128xf32, #tpu.memory_space<any>>
      tpu.enqueue_dma source(%arg8 : memref<128x128xf32, #tpu.memory_space<vmem>>) target(%43 : memref<128x128xf32, #tpu.memory_space<any>>) target_semaphore(%arg9 : memref<!tpu.dma_semaphore, #tpu.memory_space<semaphore_mem>>)
      %c0_i32_26 = arith.constant 0 : i32
      %44 = tpu.memref_slice %arg6[%1, %c0_i32_26] : memref<256x128xf32, #tpu.memory_space<any>> -> memref<128x128xf32, #tpu.memory_space<any>>
      tpu.wait_dma2 semaphore(%arg9 : memref<!tpu.dma_semaphore, #tpu.memory_space<semaphore_mem>>) src(%arg8 : memref<128x128xf32, #tpu.memory_space<vmem>>) dst(%44 : memref<128x128xf32, #tpu.memory_space<any>>)
    } else {
    }
    return
  }
  func.func @transform_1(%arg0: i32, %arg1: i32) -> (i32, i32) {
    %c0_i32 = arith.constant 0 : i32
    %c0_i32_0 = arith.constant 0 : i32
    %c0_i32_1 = arith.constant 0 : i32
    return %c0_i32, %c0_i32_0 : i32, i32
  }
  func.func @transform_2(%arg0: i32, %arg1: i32) -> (i32, i32, i32) {
    %c0_i32 = arith.constant 0 : i32
    %c0_i32_0 = arith.constant 0 : i32
    %c0_i32_1 = arith.constant 0 : i32
    return %arg0, %c0_i32, %c0_i32_0 : i32, i32, i32
  }
  func.func @transform_3(%arg0: i32, %arg1: i32) -> (i32, i32, i32) {
    %c0_i32 = arith.constant 0 : i32
    %c0_i32_0 = arith.constant 0 : i32
    %c0_i32_1 = arith.constant 0 : i32
    return %arg0, %c0_i32, %c0_i32_0 : i32, i32, i32
  }
}

</mosaic_0001>

<bundles_post_ra>
// kernel: encoder_forward.1
= control target key start
LH: loop header
LB: loop body
LE: loop exit
PB: predicated region body
PF: predicated region fallthrough
CT: control target
= control target key end

     0   :  { %s1419_s15 = smov 0   ;;  %s1421_s16 = smov 0   ;;  %s1639_s0 = inlined_call_operand.vmem [shape: bf16[256,128], index: 0, kind: input, shape index: {}]   ;;  %s1640_s1 = inlined_call_operand.vmem [shape: bf16[256,256], index: 1, kind: input, shape index: {}]   ;;  %s1641_s2 = inlined_call_operand.vmem [shape: bf16[2,128,128], index: 2, kind: input, shape index: {}]   ;;  %s1642_s3 = inlined_call_operand.vmem [shape: f32[2,1,128], index: 3, kind: input, shape index: {}]   ;;  %s1643_s4 = inlined_call_operand.vmem [shape: f32[256,128], index: 4, kind: output, shape index: {}]  }
   0x1   :  { %s1423_s17 = smov 0   ;;  %s1425_s18 = smov 0  }
   0x2   :  { %s1427_s19 = smov 0  }
   0x3 LB: > { %s20_s20 = sadd.s32 1, %s1384_s17  ;;  %s23_s21 = sadd.s32 1, %s1388_s18  ;;  %s1392_s19 = sphi %s1427_s19, %s14_s19   ;;  %s1388_s18 = sphi %s1425_s18, %s1647_s18   ;;  %s1384_s17 = sphi %s1423_s17, %s1646_s17   ;;  %s1380_s16 = sphi %s1421_s16, %s1645_s16   ;;  %s1376_s15 = sphi %s1419_s15, %s1644_s15  }
   0x4   : > { %p21_p0 = scmp.ge.s32.totalorder %s20_s20, 2  ;;  %p1011_p2 = scmp.lt.s32.totalorder %s1392_s19, 1 }
   0x5   : > { %p124_p3 = scmp.lt.s32.totalorder (!%p1011_p2), %s1380_s16, 1  ;;  %s1451_s22 = sshll.u32 (!%p1011_p2), %s1376_s15, 7 }
   0x6   : > { %s1649_s20 = smov (%p21_p0, %s20_s20), 0  ;;  %s1651_s21 = smov (!%p21_p0, %s23_s21), %s1388_s18 }
   0x7   : > { %p25_p1 = scmp.ge.s32.totalorder %s1651_s21, 2  ;;  %108 = sbr.rel (%p1011_p2) target bundleno = 558 (0x22e), region = 32 }
   0x8   : > { %p134_p4 = scmp.eq.s32.totalorder (!%p1011_p2), %s1380_s16, 0  ;;  %p135_p5 = scmp.eq.s32.totalorder (!%p1011_p2), %s1376_s15, 0 }
   0x9   : > { %s1653_s21 = smov (%p25_p1, %s1651_s21), 0 }
   0xa   : > { %p136_p6 = pnand (!%p1011_p2), %p135_p5, %p134_p4 }
   0xc   : > { %s1455_s23 = scalar_select %p124_p3, %s1380_s16, 1 }
   0xd   : > { %139 = sbr.rel (%p136_p6) target bundleno = 30 (0x1e), region = 36 }
   0xe   : > { %s1084_s24 = sshll.u32 %s1455_s23, 6  ;;  %s131_s27 = scalar_lea.vmem %s1642_s3, %s1455_s23 }
   0xf   : > { %s1465_s30 = scalar_lea.vmem %s1641_s2, %s1084_s24 }
  0x12   : > { %v173_v0 = vld [vmem:[%s1639_s0] sm:$0xff]  ;;  %v175_v1 = vld [vmem:[%s1639_s0 + $0x8] sm:$0xff]  ;;  %v177_v2 = vld [vmem:[%s1639_s0 + $0x10] sm:$0xff] }
  0x13   : > { %174 = vst [vmem:[#allocation2] sm:$0xff] %v173_v0  ;;  %176 = vst [vmem:[#allocation2 + $0x8] sm:$0xff] %v175_v1  ;;  %v179_v3 = vld [vmem:[%s1639_s0 + $0x18] sm:$0xff]  ;;  %v181_v4 = vld [vmem:[%s1639_s0 + $0x20] sm:$0xff] }
  0x14   : > { %178 = vst [vmem:[#allocation2 + $0x10] sm:$0xff] %v177_v2  ;;  %v183_v5 = vld [vmem:[%s1639_s0 + $0x28] sm:$0xff]  ;;  %180 = vst [vmem:[#allocation2 + $0x18] sm:$0xff] %v179_v3  ;;  %v185_v6 = vld [vmem:[%s1639_s0 + $0x30] sm:$0xff] }
  0x15   : > { %182 = vst [vmem:[#allocation2 + $0x20] sm:$0xff] %v181_v4  ;;  %184 = vst [vmem:[#allocation2 + $0x28] sm:$0xff] %v183_v5  ;;  %v187_v7 = vld [vmem:[%s1639_s0 + $0x38] sm:$0xff]  ;;  %v189_v8 = vld [vmem:[%s1639_s0 + $0x40] sm:$0xff] }
  0x16   : > { %186 = vst [vmem:[#allocation2 + $0x30] sm:$0xff] %v185_v6  ;;  %188 = vst [vmem:[#allocation2 + $0x38] sm:$0xff] %v187_v7  ;;  %v191_v9 = vld [vmem:[%s1639_s0 + $0x48] sm:$0xff]  ;;  %v193_v10 = vld [vmem:[%s1639_s0 + $0x50] sm:$0xff] }
  0x17   : > { %190 = vst [vmem:[#allocation2 + $0x40] sm:$0xff] %v189_v8  ;;  %v195_v11 = vld [vmem:[%s1639_s0 + $0x58] sm:$0xff]  ;;  %192 = vst [vmem:[#allocation2 + $0x48] sm:$0xff] %v191_v9  ;;  %v197_v12 = vld [vmem:[%s1639_s0 + $0x60] sm:$0xff] }
  0x18   : > { %194 = vst [vmem:[#allocation2 + $0x50] sm:$0xff] %v193_v10  ;;  %196 = vst [vmem:[#allocation2 + $0x58] sm:$0xff] %v195_v11  ;;  %v199_v13 = vld [vmem:[%s1639_s0 + $0x68] sm:$0xff]  ;;  %v201_v14 = vld [vmem:[%s1639_s0 + $0x70] sm:$0xff] }
  0x19   : > { %198 = vst [vmem:[#allocation2 + $0x60] sm:$0xff] %v197_v12  ;;  %200 = vst [vmem:[#allocation2 + $0x68] sm:$0xff] %v199_v13  ;;  %v203_v15 = vld [vmem:[%s1639_s0 + $0x78] sm:$0xff] }
  0x1a   : > { %202 = vst [vmem:[#allocation2 + $0x70] sm:$0xff] %v201_v14  ;;  %204 = vst [vmem:[#allocation2 + $0x78] sm:$0xff] %v203_v15 }
  0x1b   : > { %212 = vsyncadd [#allocation4], 2048 }
  0x1c   : > { %1370 = dma.done.wait [#allocation4], 2048 }
  0x1d   : > { %1371 = vsyncadd [#allocation4], 4294965248 }
  0x1e PF: > { %p217_p7 = scmp.lt.s32.totalorder %s1380_s16, 0  ;;  %s218_s5 = ssub.s32 0, %s1380_s16  ;;  %v1342_v16 = vld [vmem:[%s1465_s30 + $0x38] sm:$0xff]   ;;  %v1343_v17 = vld [vmem:[%s1465_s30 + $0x30] sm:$0xff]   ;;  %v1344_v31 = vld [vmem:[%s1465_s30 + $0x28] sm:$0xff]  }
  0x1f   : > { %s1015_s6 = smin.u32 %s1380_s16, %s218_s5  ;;  %s230_s7 = sshra.s32 %s1451_s22, 3  ;;  %1230 = vmatprep.subr.bf16.mxu1 %v1342_v16  ;;  %v1345_v33 = vld [vmem:[%s1465_s30 + $0x20] sm:$0xff]   ;;  %v1346_v52 = vld [vmem:[%s1465_s30 + $0x18] sm:$0xff]   ;;  %v1347_v53 = vld [vmem:[%s1465_s30 + $0x10] sm:$0xff]  }
  0x20   : > { %s220_s8 = sand.u32 1, %s1015_s6   ;;  %s1524_s11 = scalar_lea.vmem %s1640_s1, %s1451_s22  ;;  %1231 = vmatpush3.bf16.msra.mxu1 %v1342_v16  ;;  %v1348_v54 = vld [vmem:[%s1465_s30 + $0x8] sm:$0xff]   ;;  %v1349_v55 = vld [vmem:[%s1465_s30] sm:$0xff]  }
  0x21   : > { %s221_s12 = ssub.s32 0, %s220_s8  ;;  %v1320_v18 = vld [vmem:[%s1524_s11 + $0x4] ss:$8 sps:$4 sm:$0xff]   ;;  %1232 = vmatprep.subr.bf16.mxu1 %v1343_v17  ;;  %v1318_v37 = vld [vmem:[%s1524_s11] ss:$8 sps:$4 sm:$0xff]   ;;  %s751_s30 = sadd.s32 1, %s1380_s16 }
  0x22   : > { %s1655_s12 = smov (!%p217_p7, %s221_s12), %s220_s8  ;;  %494 = vmatprep.mubr.bf16.mxu0 %v1320_v18  ;;  %v1321_v38 = vld [vmem:[%s1524_s11 + $0x14] ss:$8 sps:$4 sm:$0xff]   ;;  %v1323_v39 = vld [vmem:[%s1524_s11 + $0x10] ss:$8 sps:$4 sm:$0xff]   ;;  %v1324_v40 = vld [vmem:[%s1524_s11 + $0x24] ss:$8 sps:$4 sm:$0xff]  }
  0x23   : > { %p1017_p8 = scmp.lt.s32.totalorder %s1655_s12, 0  ;;  %s227_s13 = sadd.s32 2, %s1655_s12  ;;  %v1326_v41 = vld [vmem:[%s1524_s11 + $0x20] ss:$8 sps:$4 sm:$0xff]   ;;  %v1327_v42 = vld [vmem:[%s1524_s11 + $0x34] ss:$8 sps:$4 sm:$0xff]  }
  0x24   : > { %1233 = vmatpush3.bf16.msra.mxu1 %v1343_v17  ;;  %v1329_v43 = vld [vmem:[%s1524_s11 + $0x30] ss:$8 sps:$4 sm:$0xff]   ;;  %v1330_v44 = vld [vmem:[%s1524_s11 + $0x44] ss:$8 sps:$4 sm:$0xff]   ;;  %v1332_v45 = vld [vmem:[%s1524_s11 + $0x40] ss:$8 sps:$4 sm:$0xff]  }
  0x25   : > { %s1657_s13 = smov (!%p1017_p8, %s227_s13), %s1655_s12  ;;  %1234 = vmatprep.subr.bf16.mxu1 %v1344_v31  ;;  %v1333_v46 = vld [vmem:[%s1524_s11 + $0x54] ss:$8 sps:$4 sm:$0xff]   ;;  %v1335_v47 = vld [vmem:[%s1524_s11 + $0x50] ss:$8 sps:$4 sm:$0xff]   ;;  %v1336_v48 = vld [vmem:[%s1524_s11 + $0x64] ss:$8 sps:$4 sm:$0xff]  }
  0x26   : > { %s229_s14 = ssub.s32 1, %s1657_s13  ;;  %s1086_s15 = sshll.u32 %s1657_s13, 7  ;;  %v1338_v49 = vld [vmem:[%s1524_s11 + $0x60] ss:$8 sps:$4 sm:$0xff]   ;;  %v1339_v50 = vld [vmem:[%s1524_s11 + $0x74] ss:$8 sps:$4 sm:$0xff]  }
  0x27   : > { %s1532_s24 = scalar_lea.vmem [#allocation2], %s1086_s15  ;;  %v1341_v51 = vld [vmem:[%s1524_s11 + $0x70] ss:$8 sps:$4 sm:$0xff]   ;;  %p1063_p9 = scmp.ge.s32.totalorder %s751_s30, 2 }
  0x28   : > { %v1302_v19 = vld [vmem:[%s1532_s24 + $0x78] sm:$0xff]   ;;  %v1304_v21 = vld [vmem:[%s1532_s24 + $0x70] sm:$0xff]   ;;  %v1306_v23 = vld [vmem:[%s1532_s24 + $0x68] sm:$0xff]   ;;  %1235 = vmatpush3.bf16.msra.mxu1 %v1344_v31  ;;  %s1080_s23 = sshll.u32 (!%p1063_p9), %s229_s14, 5 }
  0x29   : > { %v1303_v20 = vld [vmem:[%s1532_s24 + $0x38] sm:$0xff]   ;;  %1150 = vmatprep.subr.bf16.mxu0 %v1302_v19  ;;  %v1305_v22 = vld [vmem:[%s1532_s24 + $0x30] sm:$0xff]   ;;  %v1307_v24 = vld [vmem:[%s1532_s24 + $0x28] sm:$0xff]   ;;  %1236 = vmatprep.subr.bf16.mxu1 %v1345_v33 }
  0x2a   : > { %1151 = vmatpush3.bf16.msra.mxu0 %v1303_v20  ;;  %v1308_v25 = vld [vmem:[%s1532_s24 + $0x60] sm:$0xff]   ;;  %v1310_v27 = vld [vmem:[%s1532_s24 + $0x58] sm:$0xff]   ;;  %v1312_v29 = vld [vmem:[%s1532_s24 + $0x50] sm:$0xff]  }
  0x2b   : > { %1152 = vmatprep.subr.bf16.mxu0 %v1304_v21  ;;  %v1309_v26 = vld [vmem:[%s1532_s24 + $0x20] sm:$0xff]   ;;  %v1311_v28 = vld [vmem:[%s1532_s24 + $0x18] sm:$0xff]   ;;  %v1313_v30 = vld [vmem:[%s1532_s24 + $0x10] sm:$0xff]  }
  0x2c   : > { %v1314_v32 = vld [vmem:[%s1532_s24 + $0x48] sm:$0xff]   ;;  %v1316_v35 = vld [vmem:[%s1532_s24 + $0x40] sm:$0xff]   ;;  %1237 = vmatpush3.bf16.msra.mxu1 %v1345_v33 }
  0x2d   : > { %v1315_v34 = vld [vmem:[%s1532_s24 + $0x8] sm:$0xff]   ;;  %v1317_v36 = vld [vmem:[%s1532_s24] sm:$0xff]   ;;  %1238 = vmatprep.subr.bf16.mxu1 %v1346_v52 }
  0x2e   : > { %1153 = vmatpush3.bf16.msra.mxu0 %v1305_v22 }
  0x2f   : > { %1154 = vmatprep.subr.bf16.mxu0 %v1306_v23 }
  0x30   : > { %1239 = vmatpush3.bf16.msra.mxu1 %v1346_v52 }
  0x31   : > { %1240 = vmatprep.subr.bf16.mxu1 %v1347_v53 }
  0x32   : > { %1155 = vmatpush3.bf16.msra.mxu0 %v1307_v24 }
  0x33   : > { %1156 = vmatprep.subr.bf16.mxu0 %v1308_v25 }
  0x34   : > { %1241 = vmatpush3.bf16.msra.mxu1 %v1347_v53 }
  0x35   : > { %1242 = vmatprep.subr.bf16.mxu1 %v1348_v54 }
  0x36   : > { %1157 = vmatpush3.bf16.msra.mxu0 %v1309_v26 }
  0x37   : > { %1158 = vmatprep.subr.bf16.mxu0 %v1310_v27 }
  0x38   : > { %1243 = vmatpush3.bf16.msra.mxu1 %v1348_v54 }
  0x39   : > { %1244 = vmatprep.subr.bf16.mxu1 %v1349_v55 }
  0x3a   : > { %1159 = vmatpush3.bf16.msra.mxu0 %v1311_v28 }
  0x3b   : > { %1160 = vmatprep.subr.bf16.mxu0 %v1312_v29 }
  0x3c   : > { %1245 = vmatpush3.bf16.msra.mxu1 %v1349_v55 }
  0x3e   : > { %1161 = vmatpush3.bf16.msra.mxu0 %v1313_v30 }
  0x3f   : > { %1162 = vmatprep.subr.bf16.mxu0 %v1314_v32 }
  0x42   : > { %1163 = vmatpush3.bf16.msra.mxu0 %v1315_v34 }
  0x43   : > { %1164 = vmatprep.subr.bf16.mxu0 %v1316_v35 }
  0x46   : > { %1165 = vmatpush3.bf16.msra.mxu0 %v1317_v36 }
  0x49   : > { %495 = vmatmul.mubr.bf16.vlgmr.msra.gmra.mxu0 %v1318_v37 }
  0x4a   : > { %502 = vmatprep.mubr.bf16.mxu0 %v1321_v38 }
  0x51   : > { %503 = vmatmul.mubr.bf16.gmra.mxu0 %v1323_v39 }
  0x52   : > { %510 = vmatprep.mubr.bf16.mxu0 %v1324_v40 }
  0x59   : > { %511 = vmatmul.mubr.bf16.gmra.mxu0 %v1326_v41 }
  0x5a   : > { %518 = vmatprep.mubr.bf16.mxu0 %v1327_v42 }
  0x61   : > { %519 = vmatmul.mubr.bf16.gmra.mxu0 %v1329_v43 }
  0x62   : > { %526 = vmatprep.mubr.bf16.mxu0 %v1330_v44 }
  0x69   : > { %527 = vmatmul.mubr.bf16.gmra.mxu0 %v1332_v45 }
  0x6a   : > { %534 = vmatprep.mubr.bf16.mxu0 %v1333_v46 }
  0x71   : > { %535 = vmatmul.mubr.bf16.gmra.mxu0 %v1335_v47 }
  0x72   : > { %542 = vmatprep.mubr.bf16.mxu0 %v1336_v48  ;;  %v1054_v48 = vld [vmem:[%s131_s27] ss:$0 sm:$0xff]  ;;  %s821_s27 = sadd.s32 (!%p1063_p9), %s1080_s23, %s230_s7 }
  0x73   : > { %s1081_s28 = sshll.u32 (!%p1063_p9), %s821_s27, 2 }
  0x74   : > { %s823_s29 = scalar_lea.vmem (!%p1063_p9), [#allocation2], %s1081_s28 }
  0x79   : > { %543 = vmatmul.mubr.bf16.gmra.mxu0 %v1338_v49 }
  0x7a   : > { %550 = vmatprep.mubr.bf16.mxu0 %v1339_v50 }
  0x81   : > { %551 = vmatmul.mubr.bf16.gmra.mxu0 %v1341_v51 }
 0x109   : > { %v1166_v56 = vpop.f32.mrf.mxu0 }
 0x10b   : > { %v1167_v57 = vpop.f32.mrf.mxu0 }
 0x10c   : > { %v1168_v60 = vadd.f32 %v1167_v57, %v1166_v56 }
 0x10d   : > { %v1169_v58 = vpop.f32.mrf.mxu0 }
 0x10f   : > { %v1170_v59 = vpop.f32.mrf.mxu0 }
 0x110   : > { %v1171_v61 = vadd.f32 %v1170_v59, %v1169_v58 }
 0x111   : > { %v1172_v62 = vpop.f32.mrf.mxu0 }
 0x112   : > { %v559_v63 = vpack.c.bf16 %v1171_v61, %v1168_v60 }
 0x113   : > { %v1173_v0 = vpop.f32.mrf.mxu0 }
 0x114   : > { %1246 = vmatprep.mubr.bf16.mxu1 %v559_v63  ;;  %v1174_v3 = vadd.f32 %v1173_v0, %v1172_v62 }
 0x115   : > { %v1175_v1 = vpop.f32.mrf.mxu0 }
 0x117   : > { %v1176_v2 = vpop.f32.mrf.mxu0 }
 0x118   : > { %v1177_v4 = vadd.f32 %v1176_v2, %v1175_v1 }
 0x119   : > { %v1178_v5 = vpop.f32.mrf.mxu0 }
 0x11a   : > { %v560_v6 = vpack.c.bf16 %v1177_v4, %v1174_v3 }
 0x11b   : > { %v1179_v7 = vpop.f32.mrf.mxu0 }
 0x11c   : > { %1247 = vmatmul.mubr.bf16.vlgmr.msra.gmra.mxu1 %v560_v6  ;;  %v1180_v10 = vadd.f32 %v1179_v7, %v1178_v5 }
 0x11d   : > { %v1181_v8 = vpop.f32.mrf.mxu0 }
 0x11f   : > { %v1182_v9 = vpop.f32.mrf.mxu0 }
 0x120   : > { %v1183_v11 = vadd.f32 %v1182_v9, %v1181_v8 }
 0x121   : > { %v1184_v12 = vpop.f32.mrf.mxu0 }
 0x122   : > { %v561_v13 = vpack.c.bf16 %v1183_v11, %v1180_v10 }
 0x123   : > { %v1185_v14 = vpop.f32.mrf.mxu0 }
 0x124   : > { %1250 = vmatprep.mubr.bf16.mxu1 %v561_v13  ;;  %v1186_v17 = vadd.f32 %v1185_v14, %v1184_v12 }
 0x125   : > { %v1187_v15 = vpop.f32.mrf.mxu0 }
 0x127   : > { %v1188_v16 = vpop.f32.mrf.mxu0 }
 0x128   : > { %v1189_v18 = vadd.f32 %v1188_v16, %v1187_v15 }
 0x129   : > { %v1190_v19 = vpop.f32.mrf.mxu0 }
 0x12a   : > { %v562_v20 = vpack.c.bf16 %v1189_v18, %v1186_v17 }
 0x12b   : > { %v1191_v21 = vpop.f32.mrf.mxu0 }
 0x12c   : > { %1251 = vmatmul.mubr.bf16.gmra.mxu1 %v562_v20  ;;  %v1192_v24 = vadd.f32 %v1191_v21, %v1190_v19 }
 0x12d   : > { %v1193_v22 = vpop.f32.mrf.mxu0 }
 0x12f   : > { %v1194_v23 = vpop.f32.mrf.mxu0 }
 0x130   : > { %v1195_v25 = vadd.f32 %v1194_v23, %v1193_v22 }
 0x131   : > { %v1196_v26 = vpop.f32.mrf.mxu0 }
 0x132   : > { %v563_v27 = vpack.c.bf16 %v1195_v25, %v1192_v24 }
 0x133   : > { %v1197_v28 = vpop.f32.mrf.mxu0 }
 0x134   : > { %1254 = vmatprep.mubr.bf16.mxu1 %v563_v27  ;;  %v1198_v31 = vadd.f32 %v1197_v28, %v1196_v26 }
 0x135   : > { %v1199_v29 = vpop.f32.mrf.mxu0 }
 0x137   : > { %v1200_v30 = vpop.f32.mrf.mxu0 }
 0x138   : > { %v1201_v32 = vadd.f32 %v1200_v30, %v1199_v29 }
 0x139   : > { %v1202_v33 = vpop.f32.mrf.mxu0 }
 0x13a   : > { %v564_v34 = vpack.c.bf16 %v1201_v32, %v1198_v31 }
 0x13b   : > { %v1203_v35 = vpop.f32.mrf.mxu0 }
 0x13c   : > { %1255 = vmatmul.mubr.bf16.gmra.mxu1 %v564_v34  ;;  %v1204_v38 = vadd.f32 %v1203_v35, %v1202_v33 }
 0x13d   : > { %v1205_v36 = vpop.f32.mrf.mxu0 }
 0x13f   : > { %v1206_v37 = vpop.f32.mrf.mxu0 }
 0x140   : > { %v1207_v39 = vadd.f32 %v1206_v37, %v1205_v36 }
 0x141   : > { %v1208_v40 = vpop.f32.mrf.mxu0 }
 0x142   : > { %v565_v41 = vpack.c.bf16 %v1207_v39, %v1204_v38 }
 0x143   : > { %v1209_v42 = vpop.f32.mrf.mxu0 }
 0x144   : > { %1258 = vmatprep.mubr.bf16.mxu1 %v565_v41  ;;  %v1210_v45 = vadd.f32 %v1209_v42, %v1208_v40 }
 0x145   : > { %v1211_v43 = vpop.f32.mrf.mxu0 }
 0x147   : > { %v1212_v44 = vpop.f32.mrf.mxu0 }
 0x148   : > { %v1213_v46 = vadd.f32 %v1212_v44, %v1211_v43 }
 0x14a   : > { %v566_v47 = vpack.c.bf16 %v1213_v46, %v1210_v45 }
 0x14c   : > { %1259 = vmatmul.mubr.bf16.gmra.mxu1 %v566_v47 }
 0x1dc   : > { %v1248_v49 = vpop.f32.mrf.mxu1 }
 0x1dd   : > { %v1577_v50 = vadd.f32 %v1248_v49, %v1054_v48 }
 0x1de   : > { %v672_v51 = vpop.f32.mrf.mxu1 }
 0x1df   : > { %v737_v52 = vmax.f32 %v1577_v50, 0.0  ;;  %v1580_v53 = vadd.f32 %v1054_v48, %v672_v51 }
 0x1e0   : > { %v1249_v54 = vpop.f32.mrf.mxu1 }
 0x1e1   : > { %v735_v55 = vmax.f32 %v1580_v53, 0.0  ;;  %v1583_v56 = vadd.f32 %v1249_v54, %v1054_v48 }
 0x1e2   : > { %v675_v57 = vpop.f32.mrf.mxu1 }
 0x1e3   : > { %v738_v58 = vmax.f32 %v1583_v56, 0.0  ;;  %v1586_v59 = vadd.f32 %v1054_v48, %v675_v57 }
 0x1e5   : > { %v736_v60 = vmax.f32 %v1586_v59, 0.0 }
 0x1ec   : > { %v1252_v61 = vpop.f32.mrf.mxu1 }
 0x1ed   : > { %v1589_v62 = vadd.f32 %v1252_v61, %v1054_v48 }
 0x1ee   : > { %v688_v63 = vpop.f32.mrf.mxu1 }
 0x1ef   : > { %v741_v0 = vmax.f32 %v1589_v62, 0.0  ;;  %v689_v1 = vadd.f32 %v1054_v48, %v688_v63 }
 0x1f0   : > { %v1253_v2 = vpop.f32.mrf.mxu1 }
 0x1f1   : > { %v739_v3 = vmax.f32 %v689_v1, 0.0  ;;  %v700_v4 = vadd.f32 %v1253_v2, %v1054_v48 }
 0x1f2   : > { %v691_v5 = vpop.f32.mrf.mxu1 }
 0x1f3   : > { %v742_v6 = vmax.f32 %v700_v4, 0.0  ;;  %v692_v7 = vadd.f32 %v1054_v48, %v691_v5 }
 0x1f5   : > { %v740_v8 = vmax.f32 %v692_v7, 0.0 }
 0x1fc   : > { %v1256_v9 = vpop.f32.mrf.mxu1 }
 0x1fd   : > { %v713_v10 = vadd.f32 %v1256_v9, %v1054_v48 }
 0x1fe   : > { %v704_v11 = vpop.f32.mrf.mxu1 }
 0x1ff   : > { %v745_v12 = vmax.f32 %v713_v10, 0.0  ;;  %v705_v13 = vadd.f32 %v1054_v48, %v704_v11 }
 0x200   : > { %v1257_v14 = vpop.f32.mrf.mxu1 }
 0x201   : > { %v743_v15 = vmax.f32 %v705_v13, 0.0  ;;  %v716_v16 = vadd.f32 %v1257_v14, %v1054_v48 }
 0x202   : > { %v707_v17 = vpop.f32.mrf.mxu1 }
 0x203   : > { %v746_v18 = vmax.f32 %v716_v16, 0.0  ;;  %v708_v19 = vadd.f32 %v1054_v48, %v707_v17 }
 0x205   : > { %v744_v20 = vmax.f32 %v708_v19, 0.0 }
 0x20c   : > { %v1260_v21 = vpop.f32.mrf.mxu1 }
 0x20d   : > { %v729_v22 = vadd.f32 %v1260_v21, %v1054_v48 }
 0x20e   : > { %v720_v23 = vpop.f32.mrf.mxu1 }
 0x20f   : > { %v749_v24 = vmax.f32 %v729_v22, 0.0  ;;  %v721_v25 = vadd.f32 %v1054_v48, %v720_v23 }
 0x210   : > { %v1261_v26 = vpop.f32.mrf.mxu1 }
 0x211   : > { %v747_v27 = vmax.f32 %v721_v25, 0.0  ;;  %v732_v28 = vadd.f32 %v1261_v26, %v1054_v48  ;;  %755 = sbr.rel (%p1063_p9) target bundleno = 540 (0x21c), region = 74 }
 0x212   : > { %v723_v29 = vpop.f32.mrf.mxu1 }
 0x213   : > { %v750_v30 = vmax.f32 %v732_v28, 0.0  ;;  %v724_v31 = vadd.f32 %v1054_v48, %v723_v29 }
 0x215   : > { %v748_v32 = vmax.f32 %v724_v31, 0.0 }
 0x216   : > { %v1106_v33 = vpack.c.bf16 %v736_v60, %v735_v55  ;;  %v1111_v34 = vpack.c.bf16 %v738_v58, %v737_v52  ;;  %v1116_v35 = vpack.c.bf16 %v740_v8, %v739_v3  ;;  %v1121_v36 = vpack.c.bf16 %v742_v6, %v741_v0 }
 0x217   : > { %v1126_v37 = vpack.c.bf16 %v744_v20, %v743_v15  ;;  %v1131_v38 = vpack.c.bf16 %v746_v18, %v745_v12  ;;  %v1136_v39 = vpack.c.bf16 %v748_v32, %v747_v27  ;;  %v1141_v40 = vpack.c.bf16 %v750_v30, %v749_v24 }
 0x218   : > { %1107 = vst [vmem:[%s823_s29] sm:$0xff] %v1106_v33   ;;  %1143 = vst [vmem:[%s823_s29 + $0x8] sm:$0xff] %v1111_v34  }
 0x219   : > { %1144 = vst [vmem:[%s823_s29 + $0x10] sm:$0xff] %v1116_v35   ;;  %1145 = vst [vmem:[%s823_s29 + $0x18] sm:$0xff] %v1121_v36  }
 0x21a   : > { %1146 = vst [vmem:[%s823_s29 + $0x20] sm:$0xff] %v1126_v37   ;;  %1147 = vst [vmem:[%s823_s29 + $0x28] sm:$0xff] %v1131_v38  }
 0x21b   : > { %1148 = vst [vmem:[%s823_s29 + $0x30] sm:$0xff] %v1136_v39   ;;  %1149 = vst [vmem:[%s823_s29 + $0x38] sm:$0xff] %v1141_v40  }
 0x21c PF: > { %p1082_p10 = scmp.ne.s32.totalorder %s751_s30, 2 }
 0x21d   : > { %s860_s7 = scalar_lea.vmem (!%p1082_p10), %s1643_s4, %s1451_s22 }
 0x21e   : > { %843 = sbr.rel (%p1082_p10) target bundleno = 558 (0x22e), region = 78 }
 0x223   : > { %895 = vst [vmem:[%s860_s7] sm:$0xff] %v735_v55  ;;  %897 = vst [vmem:[%s860_s7 + $0x8] sm:$0xff] %v736_v60 }
 0x224   : > { %899 = vst [vmem:[%s860_s7 + $0x10] sm:$0xff] %v737_v52  ;;  %901 = vst [vmem:[%s860_s7 + $0x18] sm:$0xff] %v738_v58 }
 0x225   : > { %903 = vst [vmem:[%s860_s7 + $0x20] sm:$0xff] %v739_v3  ;;  %905 = vst [vmem:[%s860_s7 + $0x28] sm:$0xff] %v740_v8 }
 0x226   : > { %907 = vst [vmem:[%s860_s7 + $0x30] sm:$0xff] %v741_v0  ;;  %909 = vst [vmem:[%s860_s7 + $0x38] sm:$0xff] %v742_v6 }
 0x227   : > { %911 = vst [vmem:[%s860_s7 + $0x40] sm:$0xff] %v743_v15  ;;  %913 = vst [vmem:[%s860_s7 + $0x48] sm:$0xff] %v744_v20 }
 0x228   : > { %915 = vst [vmem:[%s860_s7 + $0x50] sm:$0xff] %v745_v12  ;;  %917 = vst [vmem:[%s860_s7 + $0x58] sm:$0xff] %v746_v18 }
 0x229   : > { %919 = vst [vmem:[%s860_s7 + $0x60] sm:$0xff] %v747_v27  ;;  %921 = vst [vmem:[%s860_s7 + $0x68] sm:$0xff] %v748_v32 }
 0x22a   : > { %923 = vst [vmem:[%s860_s7 + $0x70] sm:$0xff] %v749_v24  ;;  %925 = vst [vmem:[%s860_s7 + $0x78] sm:$0xff] %v750_v30 }
 0x22b   : > { %933 = vsyncadd [#allocation4], 2048 }
 0x22c   : > { %1372 = dma.done.wait [#allocation4], 2048 }
 0x22d   : > { %1373 = vsyncadd [#allocation4], 4294965248 }
 0x22e PF: > { %s14_s19 = sadd.s32 1, %s1392_s19   ;;  %s1644_s15 = smov %s1384_s17 }
 0x22f   : > { %p11_p11 = scmp.ge.s32.totalorder %s14_s19, 5   ;;  %s1645_s16 = smov %s1388_s18 }
 0x230   : > { %s1646_s17 = smov %s1649_s20  ;;  %s1647_s18 = smov %s1653_s21 }
 0x231   :  { %13 = sbr.rel (!%p11_p11) target bundleno = 3 (0x3), region = 149 }
 0x236   :  { %937 = vsyncmov [#allocation4] }
 0x239   :  { %s938_s22 = vpop.sfrf %937 }
 0x23a   :  { %p1083_p12 = scmp.ne.s32.totalorder %s938_s22, 0 }
 0x23c   :  { %942 = shalt.err (%p1083_p12)  }

</bundles_post_ra>
